<compile_context>
chip_gen: v7x
topology: tpu7x:2x2x1
jax: 0.10.0
libtpu: 0.0.40
codegen_flags: <defaults>
</compile_context>

<pallas_src>
import math

import jax
import jax.numpy as jnp
from jax.experimental import pallas as pl
from jax.experimental.pallas import tpu as pltpu


def _round_up(v, m):
    return ((v + m - 1) // m) * m


def dgcnn_kernel(adj_ref, xk_ref, xi_ref, deg_ref, w_ref, b_ref, o_ref, acc_ref):
    k = pl.program_id(1)

    @pl.when(k == 0)
    def _init():
        acc_ref[...] = jnp.zeros_like(acc_ref)

    # (TM, TK) bf16 adjacency tile @ (TK, F_in_pad) bf16 feature tile -> f32 accumulate (MXU).
    acc_ref[...] += jnp.dot(adj_ref[...], xk_ref[...],
                            preferred_element_type=jnp.float32)

    @pl.when(k == pl.num_programs(1) - 1)
    def _finalize():
        pool = acc_ref[...] + xi_ref[...]                     # A @ x + x (residual in f32)
        lin = jnp.dot(pool, w_ref[...],
                      preferred_element_type=jnp.float32) + b_ref[...]
        o_ref[...] = jnp.tanh(lin / deg_ref[...]).astype(o_ref.dtype)
        # TODO(synk): dropout (p > 0) not implemented in-kernel; module default p=0.0 -> identity.


def dgcnn_dense_layer(adjacency, node_degree, x, weight_t, bias,
                      *, tm=None, tk=None, vmem_limit_bytes=32 * 1024 * 1024):
    """adjacency (N,N), node_degree (N,1), x (N,F_in), weight_t (F_in,F_out)=W.T, bias (F_out,)."""
    n, f_in = x.shape
    f_out = weight_t.shape[1]

    # Tile sizes: (8,128)-aligned, sized against the smallest VMEM budget (v7x: 64 MiB physical).
    if tm is None:
        tm = 128 if n <= 1024 else 256
    if tk is None:
        tk = 128 if n <= 1024 else 512

    n_pad = _round_up(n, math.lcm(tm, tk))
    f_in_pad = _round_up(f_in, 128)
    f_out_pad = _round_up(f_out, 128)

    def pad2d(a, rows, cols, value=0.0):
        return jnp.pad(a, ((0, rows - a.shape[0]), (0, cols - a.shape[1])),
                       constant_values=value)

    adj_p = pad2d(adjacency, n_pad, n_pad).astype(jnp.bfloat16)     # 0/1 -> lossless in bf16
    x_p = pad2d(x, n_pad, f_in_pad)                                  # f32 residual operand
    xk_p = x_p.astype(jnp.bfloat16)                                  # bf16 contraction operand
    deg_p = pad2d(node_degree, n_pad, 1, value=1.0)                  # pad with 1 -> no 0-division
    w_p = pad2d(weight_t, f_in_pad, f_out_pad)
    b_p = pad2d(bias.reshape(1, f_out), 1, f_out_pad)

    grid = (n_pad // tm, n_pad // tk)

    out_p = pl.pallas_call(
        dgcnn_kernel,
        out_shape=jax.ShapeDtypeStruct((n_pad, f_out_pad), x.dtype),
        grid_spec=pltpu.PrefetchScalarGridSpec(
            num_scalar_prefetch=0,
            grid=grid,
            in_specs=[
                pl.BlockSpec((tm, tk), lambda i, k: (i, k)),              # adjacency tile (bf16)
                pl.BlockSpec((tk, f_in_pad), lambda i, k: (k, 0)),        # x contraction tile (bf16)
                pl.BlockSpec((tm, f_in_pad), lambda i, k: (i, 0)),        # x residual row tile (f32)
                pl.BlockSpec((tm, 1), lambda i, k: (i, 0)),               # node-degree column
                pl.BlockSpec((f_in_pad, f_out_pad), lambda i, k: (0, 0)),  # W^T (VMEM-resident)
                pl.BlockSpec((1, f_out_pad), lambda i, k: (0, 0)),        # bias (VMEM-resident)
            ],
            out_specs=pl.BlockSpec((tm, f_out_pad), lambda i, k: (i, 0)),
            scratch_shapes=[pltpu.VMEM((tm, f_in_pad), jnp.float32)],
        ),
        compiler_params=pltpu.CompilerParams(
            dimension_semantics=("parallel", "arbitrary"),
            vmem_limit_bytes=vmem_limit_bytes,
        ),
    )(adj_p, xk_p, x_p, deg_p, w_p, b_p)

    return out_p[:n, :f_out]


if __name__ == "__main__":
    key = jax.random.PRNGKey(0)
    k_adj, k_x, k_w, k_b = jax.random.split(key, 4)

    N = 256       # nodes (exercises a 2x2 tiled grid with TM=TK=128)
    F_IN = 32     # input_dim
    F_OUT = 32    # latent_dim

    # Symmetric 0/1 adjacency, no self loops.
    upper = (jax.random.uniform(k_adj, (N, N)) > 0.9).astype(jnp.float32)
    adjacency = jnp.triu(upper, k=1)
    adjacency = adjacency + adjacency.T

    # DGCNN node-degree column (degree + 1 for the self term), shape (N, 1).
    node_degree = jnp.sum(adjacency, axis=1, keepdims=True) + 1.0

    x = jax.random.normal(k_x, (N, F_IN), dtype=jnp.float32)

    # PyTorch-style Linear(input_dim, latent_dim) params.
    bound = 1.0 / (F_IN ** 0.5)
    weight = jax.random.uniform(k_w, (F_OUT, F_IN), minval=-bound, maxval=bound,
                                dtype=jnp.float32)           # (out, in) PyTorch layout
    bias = jax.random.uniform(k_b, (F_OUT,), minval=-bound, maxval=bound,
                              dtype=jnp.float32)
    weight_t = weight.T                                       # (F_IN, F_OUT) for the kernel

    out = dgcnn_dense_layer(adjacency, node_degree, x, weight_t, bias)
    out = jax.block_until_ready(out)

    # Pure-JAX reference with the same mixed precision as the kernel (bf16 A @ bf16 x, f32 acc).
    pool_ref = jnp.dot(adjacency.astype(jnp.bfloat16), x.astype(jnp.bfloat16),
                       preferred_element_type=jnp.float32) + x
    lin_ref = jnp.dot(pool_ref, weight_t,
                      preferred_element_type=jnp.float32) + bias.reshape(1, F_OUT)
    ref = jnp.tanh(lin_ref / node_degree)

    assert out.shape == (N, F_OUT)
    assert jnp.allclose(out, ref, atol=2e-2, rtol=2e-2), "mismatch vs reference"

    print("KERNEL_OK")
</pallas_src>

<mosaic_0001>
module attributes {stable_mosaic.version = 11 : i64} {
  func.func @dgcnn_kernel(%arg0: i32, %arg1: i32, %arg2: memref<128x128xbf16, #tpu.memory_space<vmem>>, %arg3: memref<128x128xbf16, #tpu.memory_space<vmem>>, %arg4: memref<128x128xf32, #tpu.memory_space<vmem>>, %arg5: memref<128x1xf32, #tpu.memory_space<vmem>>, %arg6: memref<128x128xf32, #tpu.memory_space<vmem>>, %arg7: memref<1x128xf32, #tpu.memory_space<vmem>>, %arg8: memref<128x128xf32, #tpu.memory_space<vmem>>, %arg9: memref<128x128xf32, #tpu.memory_space<vmem>>) attributes {dimension_semantics = [#tpu.dimension_semantics<parallel>, #tpu.dimension_semantics<arbitrary>], iteration_bounds = array<i64: 2, 2>, scalar_prefetch = 0 : i64, scratch_operands = 1 : i64, tpu.core_type = #tpu.core_type<tc>, window_params = [{transform_indices = @transform_0, window_bounds = array<i64: 128, 128>}, {transform_indices = @transform_1, window_bounds = array<i64: 128, 128>}, {transform_indices = @transform_2, window_bounds = array<i64: 128, 128>}, {transform_indices = @transform_3, window_bounds = array<i64: 128, 1>}, {pipeline_mode = #tpu.pipeline_mode<synchronous>, transform_indices = @transform_4, window_bounds = array<i64: 128, 128>}, {pipeline_mode = #tpu.pipeline_mode<synchronous>, transform_indices = @transform_5, window_bounds = array<i64: 1, 128>}, {transform_indices = @transform_6, window_bounds = array<i64: 128, 128>}]} {
    %c0_i32 = arith.constant 0 : i32
    %0 = arith.cmpi eq, %arg1, %c0_i32 : i32
    %1 = arith.extui %0 : i1 to i32
    %c0_i32_0 = arith.constant 0 : i32
    %2 = arith.cmpi ne, %1, %c0_i32_0 : i32
    scf.if %2 {
      %cst_9 = arith.constant 0.000000e+00 : f32
      %12 = vector.broadcast %cst_9 : f32 to vector<128x128xf32>
      %c0_10 = arith.constant 0 : index
      %c0_11 = arith.constant 0 : index
      %13 = vector.load %arg9[%c0_10, %c0_11] : memref<128x128xf32, #tpu.memory_space<vmem>>, vector<128x128xf32>
      tpu.vector_store %arg9[%c0_10, %c0_11], %12 {strides = array<i32>} : memref<128x128xf32, #tpu.memory_space<vmem>>, vector<128x128xf32>,
    } else {
    }
    %c0 = arith.constant 0 : index
    %c0_1 = arith.constant 0 : index
    %3 = vector.load %arg9[%c0, %c0_1] : memref<128x128xf32, #tpu.memory_space<vmem>>, vector<128x128xf32>
    %c0_2 = arith.constant 0 : index
    %c0_3 = arith.constant 0 : index
    %4 = vector.load %arg2[%c0_2, %c0_3] : memref<128x128xbf16, #tpu.memory_space<vmem>>, vector<128x128xbf16>
    %c0_4 = arith.constant 0 : index
    %c0_5 = arith.constant 0 : index
    %5 = vector.load %arg3[%c0_4, %c0_5] : memref<128x128xbf16, #tpu.memory_space<vmem>>, vector<128x128xbf16>
    %cst = arith.constant dense<0.000000e+00> : vector<128x128xf32>
    %6 = tpu.matmul %4, %5, %cst {dimension_numbers = #tpu.dot_dimension_numbers<[1], [0], [0], [1], [0, 0, 1, 1], [], []>} : vector<128x128xbf16>, vector<128x128xbf16>, vector<128x128xf32> -> vector<128x128xf32>
    %7 = arith.addf %3, %6 : vector<128x128xf32>
    %c0_6 = arith.constant 0 : index
    %c0_7 = arith.constant 0 : index
    %8 = vector.load %arg9[%c0_6, %c0_7] : memref<128x128xf32, #tpu.memory_space<vmem>>, vector<128x128xf32>
    tpu.vector_store %arg9[%c0_6, %c0_7], %7 {strides = array<i32>} : memref<128x128xf32, #tpu.memory_space<vmem>>, vector<128x128xf32>,
    %c1_i32 = arith.constant 1 : i32
    %9 = arith.cmpi eq, %arg1, %c1_i32 : i32
    %10 = arith.extui %9 : i1 to i32
    %c0_i32_8 = arith.constant 0 : i32
    %11 = arith.cmpi ne, %10, %c0_i32_8 : i32
    scf.if %11 {
      %c0_9 = arith.constant 0 : index
      %c0_10 = arith.constant 0 : index
      %12 = vector.load %arg9[%c0_9, %c0_10] : memref<128x128xf32, #tpu.memory_space<vmem>>, vector<128x128xf32>
      %c0_11 = arith.constant 0 : index
      %c0_12 = arith.constant 0 : index
      %13 = vector.load %arg4[%c0_11, %c0_12] : memref<128x128xf32, #tpu.memory_space<vmem>>, vector<128x128xf32>
      %14 = arith.addf %12, %13 : vector<128x128xf32>
      %c0_13 = arith.constant 0 : index
      %c0_14 = arith.constant 0 : index
      %15 = vector.load %arg6[%c0_13, %c0_14] : memref<128x128xf32, #tpu.memory_space<vmem>>, vector<128x128xf32>
      %cst_15 = arith.constant dense<0.000000e+00> : vector<128x128xf32>
      %16 = tpu.matmul %14, %15, %cst_15 {dimension_numbers = #tpu.dot_dimension_numbers<[1], [0], [0], [1], [0, 0, 1, 1], [], []>} : vector<128x128xf32>, vector<128x128xf32>, vector<128x128xf32> -> vector<128x128xf32>
      %c0_16 = arith.constant 0 : index
      %c0_17 = arith.constant 0 : index
      %17 = vector.load %arg7[%c0_16, %c0_17] : memref<1x128xf32, #tpu.memory_space<vmem>>, vector<1x128xf32>
      %18 = vector.broadcast %17 : vector<1x128xf32> to vector<128x128xf32>
      %19 = arith.addf %16, %18 : vector<128x128xf32>
      %c0_18 = arith.constant 0 : index
      %c0_19 = arith.constant 0 : index
      %20 = vector.load %arg5[%c0_18, %c0_19] : memref<128x1xf32, #tpu.memory_space<vmem>>, vector<128x1xf32>
      %21 = vector.broadcast %20 : vector<128x1xf32> to vector<128x128xf32>
      %22 = arith.divf %19, %21 : vector<128x128xf32>
      %23 = math.tanh %22 : vector<128x128xf32>
      %c0_20 = arith.constant 0 : index
      %c0_21 = arith.constant 0 : index
      %24 = vector.load %arg8[%c0_20, %c0_21] : memref<128x128xf32, #tpu.memory_space<vmem>>, vector<128x128xf32>
      tpu.vector_store %arg8[%c0_20, %c0_21], %23 {strides = array<i32>} : memref<128x128xf32, #tpu.memory_space<vmem>>, vector<128x128xf32>,
    } else {
    }
    return
  }
  func.func @transform_0(%arg0: i32, %arg1: i32) -> (i32, i32) {
    %c0_i32 = arith.constant 0 : i32
    return %arg0, %arg1 : i32, i32
  }
  func.func @transform_1(%arg0: i32, %arg1: i32) -> (i32, i32) {
    %c0_i32 = arith.constant 0 : i32
    %c0_i32_0 = arith.constant 0 : i32
    return %arg1, %c0_i32 : i32, i32
  }
  func.func @transform_2(%arg0: i32, %arg1: i32) -> (i32, i32) {
    %c0_i32 = arith.constant 0 : i32
    %c0_i32_0 = arith.constant 0 : i32
    return %arg0, %c0_i32 : i32, i32
  }
  func.func @transform_3(%arg0: i32, %arg1: i32) -> (i32, i32) {
    %c0_i32 = arith.constant 0 : i32
    %c0_i32_0 = arith.constant 0 : i32
    return %arg0, %c0_i32 : i32, i32
  }
  func.func @transform_4(%arg0: i32, %arg1: i32) -> (i32, i32) {
    %c0_i32 = arith.constant 0 : i32
    %c0_i32_0 = arith.constant 0 : i32
    %c0_i32_1 = arith.constant 0 : i32
    return %c0_i32, %c0_i32_0 : i32, i32
  }
  func.func @transform_5(%arg0: i32, %arg1: i32) -> (i32, i32) {
    %c0_i32 = arith.constant 0 : i32
    %c0_i32_0 = arith.constant 0 : i32
    %c0_i32_1 = arith.constant 0 : i32
    return %c0_i32, %c0_i32_0 : i32, i32
  }
  func.func @transform_6(%arg0: i32, %arg1: i32) -> (i32, i32) {
    %c0_i32 = arith.constant 0 : i32
    %c0_i32_0 = arith.constant 0 : i32
    return %arg0, %c0_i32 : i32, i32
  }
}

</mosaic_0001>

<bundles_post_ra>
// kernel: tpu_custom_call.1
= control target key start
LH: loop header
LB: loop body
LE: loop exit
PB: predicated region body
PF: predicated region fallthrough
CT: control target
= control target key end

     0   :  { %s2548_s0 = inlined_call_operand.vmem [shape: bf16[256,256], index: 0, kind: input, shape index: {}]   ;;  %s2549_s1 = inlined_call_operand.hbm [shape: bf16[256,128], index: 1, kind: input, shape index: {}]   ;;  %s2550_s2 = inlined_call_operand.hbm [shape: f32[256,128], index: 2, kind: input, shape index: {}]   ;;  %s2551_s3 = inlined_call_operand.vmem [shape: f32[256,1], index: 3, kind: input, shape index: {}]   ;;  %s2552_s4 = inlined_call_operand.hbm [shape: f32[128,128], index: 4, kind: input, shape index: {}]   ;;  %s2553_s5 = inlined_call_operand.vmem [shape: f32[1,128], index: 5, kind: input, shape index: {}]   ;;  %s2554_s6 = inlined_call_operand.hbm [shape: f32[256,128], index: 6, kind: output, shape index: {}]  }
   0x1   :  { %2573 = sst [smem:[#allocation27_spill]] %s2548_s0 }
   0x2   :  { %2574 = sst [smem:[#allocation28_spill]] %s2551_s3 }
   0x3   :  { %2575 = sst [smem:[#allocation29_spill]] %s2553_s5 }
   0x4   :  { %2576 = sst [smem:[#allocation30_spill]] %s2554_s6 }
   0x5   :  { %11 = vsyncpa [#allocation5], 0 }
   0x6   :  { %13 = vsyncpa [#allocation5 + $0x1], 0 }
   0x7   :  { %14 = vsyncpa [#allocation8], 0 }
   0x8   :  { %16 = vsyncpa [#allocation8 + $0x1], 0 }
   0x9   :  { %17 = vsyncpa [#allocation6], 0 }
   0xa   :  { %19 = vsyncpa [#allocation6 + $0x1], 0  ;;  %s2074_s21 = smov 0   ;;  %s2076_s22 = smov 0  }
   0xb   :  { %s2078_s23 = smov 0   ;;  %s2080_s24 = smov 0  }
   0xc   :  { %s2082_s25 = smov 0   ;;  %s2084_s26 = smov 0  }
   0xd   :  { %s2086_s27 = smov 0   ;;  %s2088_s28 = smov 0  }
   0xe   :  { %s2090_s29 = smov 0   ;;  %s2092_s30 = smov 0  }
   0xf   :  { %s2094_s7 = smov 0   ;;  %s2096_s8 = smov 0  }
  0x10   :  { %s2098_s9 = smov 0  }
  0x11 LB: > { %2577 = sst [smem:[#allocation15_spill]] %s1975_s21  ;;  %s2140_s10 = sadd.s32 4294967295, %s2023_s9   ;;  %s2023_s9 = sphi %s2098_s9, %s25_s9   ;;  %s2019_s8 = sphi %s2096_s8, %s2641_s8   ;;  %s2015_s7 = sphi %s2094_s7, %s2640_s7   ;;  %s2011_s30 = sphi %s2092_s30, %s2639_s30   ;;  %s2007_s29 = sphi %s2090_s29, %s2638_s29   ;;  %s2003_s28 = sphi %s2088_s28, %s2637_s28   ;;  %s1999_s27 = sphi %s2086_s27, %s2636_s27   ;;  %s1995_s26 = sphi %s2084_s26, %s2635_s26   ;;  %s1991_s25 = sphi %s2082_s25, %s2634_s25   ;;  %s1987_s24 = sphi %s2080_s24, %s2633_s24   ;;  %s1983_s23 = sphi %s2078_s23, %s2632_s23   ;;  %s1979_s22 = sphi %s2076_s22, %s2631_s22   ;;  %s1975_s21 = sphi %s2074_s21, %s2625_s21  }
  0x12   : > { %2578 = sst [smem:[#allocation16_spill]] %s1979_s22  ;;  %s34_s12 = sadd.s32 1, %s2015_s7 }
  0x13   : > { %2579 = sst [smem:[#allocation17_spill]] %s2007_s29  ;;  %s37_s13 = sadd.s32 1, %s2019_s8 }
  0x14   : > { %2580 = sst [smem:[#allocation18_spill]] %s2011_s30  ;;  %p35_p0 = scmp.ge.s32.totalorder %s34_s12, 2 }
  0x15   : > { %s46_s14 = sadd.s32 1, %s2003_s28  ;;  %p53_p1 = scmp.ne.s32.totalorder %s2003_s28, %s1999_s27 }
  0x16   : > { %p54_p2 = scmp.eq.s32.totalorder %s2023_s9, 0  ;;  %s2643_s12 = smov (%p35_p0, %s34_s12), 0 }
  0x17   : > { %2581 = sst [smem:[#allocation19_spill]] %s2643_s12  ;;  %s2645_s13 = smov (!%p35_p0, %s37_s13), %s2019_s8 }
  0x18   : > { %s42_s15 = ssub.s32 %s2015_s7, %s2643_s12  ;;  %p2156_p3 = por %p54_p2, %p53_p1 }
  0x19   : > { %p39_p4 = scmp.ge.s32.totalorder %s2645_s13, 2  ;;  %p70_p5 = scmp.eq.s32.totalorder %s42_s15, 0 }
  0x1a   : > { %s2582_s16 = scalar_select %p2156_p3, 1, 0 }
  0x1b   : > { %s72_s17 = sadd.s32 1, %s1995_s26  ;;  %p79_p6 = scmp.ne.s32.totalorder %s1995_s26, %s1991_s25 }
  0x1c   : > { %s2647_s13 = smov (%p39_p4, %s2645_s13), 0  ;;  %p85_p8 = scmp.ne.s32.totalorder %s1991_s25, %s1987_s24 }
  0x1d   : > { %2583 = sst [smem:[#allocation20_spill]] %s2647_s13  ;;  %s41_s19 = ssub.s32 %s2019_s8, %s2647_s13 }
  0x1e   : > { %s2166_s18 = scalar_select %p70_p5, %s1995_s26, %s72_s17  }
  0x1f   : > { %p2172_p7 = por %p79_p6, %p54_p2  ;;  %s43_s11 = sor.u32 %s42_s15, %s41_s19 }
  0x20   : > { %2584 = sst [smem:[#allocation21_spill]] %s2166_s18  ;;  %p44_p9 = scmp.eq.s32.totalorder %s43_s11, 0 }
  0x21   : > { %s2585_s20 = scalar_select %p2172_p7, 1, 0 }
  0x22   : > { %p2559_p10 = scmp.eq.s32.totalorder %s2140_s10, 0  ;;  %p96_p11 = scmp.eq.s32.totalorder %s41_s19, 0 }
  0x23   : > { %s98_s12 = sadd.s32 1, %s1983_s23  ;;  %p105_p13 = scmp.ne.s32.totalorder %s1983_s23, %s1979_s22 }
  0x24   : > { %s2181_s6 = scalar_select %p44_p9, %s2003_s28, %s46_s14  }
  0x25   : > { %p2185_p12 = por %p2559_p10, %p85_p8  ;;  %p2196_p0 = por %p105_p13, %p54_p2 }
  0x26   : > { %2586 = sst [smem:[#allocation22_spill]] %s2181_s6  ;;  %p111_p1 = scmp.ne.s32.totalorder %s1979_s22, %s1975_s21 }
  0x27   : > { %s2587_s17 = scalar_select %p2185_p12, 1, 0 }
  0x28   : > { %s2192_s13 = scalar_select %p96_p11, %s1983_s23, %s98_s12  }
  0x29   : > { %s2589_s15 = scalar_select %p2196_p0, 1, 0 }
  0x2a   : > { %2588 = sst [smem:[#allocation23_spill]] %s2192_s13  ;;  %p203_p4 = scmp.eq.s32.totalorder %s2140_s10, 3 }
  0x2b   : > { %s2590_s24 = sadd.s32 4294967294, %s2023_s9   ;;  %p2207_p6 = por %p111_p1, %p2559_p10 }
  0x2c   : > { %p209_p5 = scmp.eq.s32.totalorder %s2590_s24, 3  ;;  %p1326_p8 = scmp.ge.s32.totalorder %s2023_s9, 1 }
  0x2d   : > { %s2591_s11 = scalar_select %p2207_p6, 1, 0 }
  0x2e   : > { %p2212_p9 = por %p203_p4, %p105_p13  ;;  %p2216_p11 = por %p209_p5, %p111_p1 }
  0x2f   : > { %2592 = sst [smem:[#allocation24_spill]] %s2591_s11  ;;  %p216_p2 = scmp.lt.s32.totalorder %s2023_s9, 5 }
  0x30   : > { %s2593_s14 = scalar_select %p2212_p9, 1, 0 }
  0x31   : > { %s2595_s12 = scalar_select %p2216_p11, 1, 0 }
  0x32   : > { %2594 = sst [smem:[#allocation25_spill]] %s2593_s14  ;;  %p2221_p12 = pnand %p1326_p8, %p216_p2 }
  0x33   : > { %2596 = sst [smem:[#allocation26_spill]] %s2595_s12  ;;  %s2025_s24 = smov [#allocation9]  }
  0x34   : > { %s2597_s19 = scalar_select %p2221_p12, 1, 0 }
  0x35   : > { %s228_s6 = sshll.u32 %s2025_s24, 4  ;;  %p1585_p10 = pneg %p2221_p12  ;;  %s229_s6 = int_to_ptr.vmem [resolvable:$true] %s228_s6 }
  0x36   : > { %p2598_p6 = scmp.eq.s32.totalorder %s2140_s10, 0  ;;  %s1793_s12 = scalar_lea.hbm %s2552_s4, 2048 }
  0x37   : > { %p1794_p1 = scmp.ne.s32.totalorder %s2552_s4, %s1793_s12 }
  0x38   : > { %p2229_p13 = pnand %p1585_p10, %p2598_p6  ;;  %p1800_p10 = scmp.lt.u32.totalorder %s1793_s12, %s2552_s4 }
  0x3a   : > { %p1795_p4 = pneg %p2229_p13 }
  0x3c   : > { %p1796_p5 = pnand %p1795_p4, %p1794_p1 }
  0x3e   : > { %p1797_p8 = pneg %p1796_p5 }
  0x40   : > { %p1802_p6 = pnand %p1800_p10, %p1797_p8 }
  0x42   : > { %1805 = shalt.err (!%p1802_p6)
}
  0x43   : > { %s1806_s3 = scalar_lea.vmem %s229_s6, 2048  ;;  %p1814_p12 = scmp.lt.s32.totalorder %s229_s6, %s229_s6 }
  0x44   : > { %p1807_p2 = scmp.ne.s32.totalorder %s229_s6, %s1806_s3  ;;  %p1815_p0 = scmp.lt.s32.totalorder %s1806_s3, %s1806_s3 }
  0x46   : > { %p1809_p11 = pnand %p1807_p2, %p1795_p4  ;;  %p1816_p7 = por %p1815_p0, %p1814_p12 }
  0x48   : > { %p1810_p9 = pneg %p1809_p11 }
  0x4a   : > { %p1817_p3 = pnand %p1816_p7, %p1810_p9 }
  0x4c   : > { %1820 = shalt.err (!%p1817_p3)
}
  0x4d   : > { %s2026_s5 = smov 128   ;;  %s2027_s21 = smov 8  }
  0x4e   : > { %1588 = dma.hbm_to_vmem [thread:$0]  (!%p2229_p13), %s2552_s4, 2048, %s229_s6, [#allocation8], %s2026_s5, %s2026_s5, %s2027_s21  }
  0x4f   : > { %p1328_p1 = scmp.ge.s32.totalorder %s2023_s9, 4 }
  0x50   : > { %p2600_p5 = scmp.ne.s32.totalorder (!%p1328_p1), %s2582_s16, 0 }
  0x51   : > { %241 = sbr.rel (%p1328_p1) target bundleno = 162 (0xa2), region = 24 }
  0x58   : > { %244 = sbr.rel (!%p2600_p5) target bundleno = 108 (0x6c), region = 28  ;;  %s246_s3 = sand.u32 (%p2600_p5), 1, %s2003_s28  }
  0x59   : > { %s1371_s29 = sshll.u32 (%p2600_p5), %s2019_s8, 5  ;;  %s1329_s12 = sshll.u32 (%p2600_p5), %s246_s3, 6 }
  0x5a   : > { %s251_s24 = sadd.s32 (%p2600_p5), %s2015_s7, %s1371_s29  ;;  %s2601_s0 = sld [smem:[#allocation27_spill]] (%p2600_p5) }
  0x5b   : > { %s1332_s30 = sshll.u32 (%p2600_p5), %s251_s24, 2  ;;  %s248_s6 = scalar_lea.vmem (%p2600_p5), [#allocation3], %s1329_s12 }
  0x60   : > { %s2258_s22 = scalar_lea.vmem %s2601_s0, %s1332_s30 }
  0x61   : > { %v269_v0 = vld [vmem:[%s2258_s22] sm:$0xf]  ;;  %v271_v1 = vld [vmem:[%s2258_s22 + $0x8] sm:$0xf]  ;;  %v273_v2 = vld [vmem:[%s2258_s22 + $0x10] sm:$0xf] }
  0x62   : > { %270 = vst [vmem:[%s248_s6] sm:$0xf] %v269_v0  ;;  %272 = vst [vmem:[%s248_s6 + $0x4] sm:$0xf] %v271_v1  ;;  %v275_v3 = vld [vmem:[%s2258_s22 + $0x18] sm:$0xf] }
  0x63   : > { %274 = vst [vmem:[%s248_s6 + $0x8] sm:$0xf] %v273_v2  ;;  %v277_v4 = vld [vmem:[%s2258_s22 + $0x20] sm:$0xf]  ;;  %v279_v5 = vld [vmem:[%s2258_s22 + $0x28] sm:$0xf] }
  0x64   : > { %276 = vst [vmem:[%s248_s6 + $0xc] sm:$0xf] %v275_v3  ;;  %278 = vst [vmem:[%s248_s6 + $0x10] sm:$0xf] %v277_v4  ;;  %v281_v6 = vld [vmem:[%s2258_s22 + $0x30] sm:$0xf] }
  0x65   : > { %280 = vst [vmem:[%s248_s6 + $0x14] sm:$0xf] %v279_v5  ;;  %v283_v7 = vld [vmem:[%s2258_s22 + $0x38] sm:$0xf]  ;;  %v285_v8 = vld [vmem:[%s2258_s22 + $0x40] sm:$0xf] }
  0x66   : > { %282 = vst [vmem:[%s248_s6 + $0x18] sm:$0xf] %v281_v6  ;;  %284 = vst [vmem:[%s248_s6 + $0x1c] sm:$0xf] %v283_v7  ;;  %v287_v9 = vld [vmem:[%s2258_s22 + $0x48] sm:$0xf] }
  0x67   : > { %286 = vst [vmem:[%s248_s6 + $0x20] sm:$0xf] %v285_v8  ;;  %v289_v10 = vld [vmem:[%s2258_s22 + $0x50] sm:$0xf]  ;;  %v291_v11 = vld [vmem:[%s2258_s22 + $0x58] sm:$0xf] }
  0x68   : > { %288 = vst [vmem:[%s248_s6 + $0x24] sm:$0xf] %v287_v9  ;;  %290 = vst [vmem:[%s248_s6 + $0x28] sm:$0xf] %v289_v10  ;;  %v293_v12 = vld [vmem:[%s2258_s22 + $0x60] sm:$0xf] }
  0x69   : > { %292 = vst [vmem:[%s248_s6 + $0x2c] sm:$0xf] %v291_v11  ;;  %v295_v13 = vld [vmem:[%s2258_s22 + $0x68] sm:$0xf]  ;;  %v297_v14 = vld [vmem:[%s2258_s22 + $0x70] sm:$0xf] }
  0x6a   : > { %294 = vst [vmem:[%s248_s6 + $0x30] sm:$0xf] %v293_v12  ;;  %296 = vst [vmem:[%s248_s6 + $0x34] sm:$0xf] %v295_v13  ;;  %v299_v15 = vld [vmem:[%s2258_s22 + $0x78] sm:$0xf] }
  0x6b   : > { %298 = vst [vmem:[%s248_s6 + $0x38] sm:$0xf] %v297_v14  ;;  %300 = vst [vmem:[%s248_s6 + $0x3c] sm:$0xf] %v299_v15 }
  0x6c PF: > { %s356_s30 = sand.u32 1, %s1995_s26   ;;  %s1372_s16 = sshll.u32 %s2015_s7, 10 }
  0x6d   : > { %s1333_s11 = sshll.u32 %s356_s30, 6  ;;  %s2281_s13 = scalar_lea.hbm %s2549_s1, %s1372_s16 }
  0x6e   : > { %s360_s14 = scalar_lea.vmem [#allocation4], %s1333_s11  ;;  %s2285_s22 = scalar_lea.sflag [#allocation5], %s356_s30 }
  0x6f   : > { %s367_s3 = sshll.u32 %s360_s14, 4  ;;  %s1821_s29 = scalar_lea.hbm %s2281_s13, 1024  ;;  %s2283_s3 = int_to_ptr.vmem [resolvable:$true] %s367_s3 }
  0x70   : > { %p1822_p3 = scmp.ne.s32.totalorder %s2281_s13, %s1821_s29  ;;  %p2602_p7 = scmp.ne.s32.totalorder %s2585_s20, 0 }
  0x71   : > { %s1825_s18 = scalar_lea.hbm %s2549_s1, 2048  ;;  %p1826_p9 = scmp.lt.u32.totalorder %s2281_s13, %s2549_s1 }
  0x72   : > { %p1823_p12 = pnand %p1822_p3, %p2602_p7  ;;  %p1827_p11 = scmp.lt.u32.totalorder %s1825_s18, %s1821_s29 }
  0x73   : > { %p1829_p4 = scmp.lt.u32.totalorder %s1821_s29, %s2281_s13 }
  0x74   : > { %p1824_p0 = pneg %p1823_p12  ;;  %p1828_p13 = por %p1827_p11, %p1826_p9 }
  0x76   : > { %p1830_p8 = por %p1829_p4, %p1828_p13 }
  0x78   : > { %p1831_p10 = pnand %p1830_p8, %p1824_p0 }
  0x7a   : > { %1834 = shalt.err (!%p1831_p10)
}
  0x7b   : > { %s1835_s30 = scalar_lea.vmem %s2283_s3, 1024  ;;  %s2028_s11 = smov [#allocation4]  }
  0x7c   : > { %p1836_p6 = scmp.ne.s32.totalorder %s2283_s3, %s1835_s30  ;;  %s1839_s5 = sshll.u32 %s2028_s11, 4  ;;  %s1840_s5 = int_to_ptr.vmem [resolvable:$false] %s1839_s5 }
  0x7d   : > { %s1841_s21 = scalar_lea.vmem %s1840_s5, 2048  ;;  %p1842_p5 = scmp.lt.s32.totalorder %s2283_s3, %s1840_s5 }
  0x7e   : > { %p1837_p2 = pnand %p1836_p6, %p2602_p7  ;;  %p1843_p3 = scmp.lt.s32.totalorder %s1841_s21, %s1835_s30 }
  0x80   : > { %p1838_p1 = pneg %p1837_p2  ;;  %p1844_p12 = por %p1843_p3, %p1842_p5 }
  0x82   : > { %p1845_p9 = pnand %p1844_p12, %p1838_p1 }
  0x84   : > { %1848 = shalt.err (!%p1845_p9)
}
  0x85   : > { %s2029_s14 = smov 64   ;;  %s2030_s29 = smov 4  }
  0x86   : > { %1577 = dma.hbm_to_vmem [thread:$0]  (%p2602_p7), %s2281_s13, 1024, %s2283_s3, %s2285_s22, %s2029_s14, %s2029_s14, %s2030_s29  }
  0x87   : > { %s377_s12 = sand.u32 1, %s2023_s9   ;;  %s379_s24 = sand.u32 1, %s1983_s23  }
  0x88   : > { %s1336_s18 = sshll.u32 %s379_s24, 7  ;;  %s1373_s6 = sshll.u32 %s2019_s8, 11 }
  0x89   : > { %s2315_s11 = scalar_lea.hbm %s2550_s2, %s1373_s6  ;;  %s381_s5 = scalar_lea.vmem [#allocation7], %s1336_s18 }
  0x8a   : > { %s388_s21 = sshll.u32 %s381_s5, 4  ;;  %s2319_s0 = scalar_lea.sflag [#allocation8], %s377_s12  ;;  %s2317_s21 = int_to_ptr.vmem [resolvable:$true] %s388_s21 }
  0x8b   : > { %s1849_s20 = scalar_lea.hbm %s2315_s11, 2048  ;;  %p2603_p0 = scmp.ne.s32.totalorder %s2589_s15, 0 }
  0x8c   : > { %p1850_p7 = scmp.ne.s32.totalorder %s2315_s11, %s1849_s20  ;;  %s1853_s22 = scalar_lea.hbm %s2550_s2, 4096 }
  0x8d   : > { %p1854_p4 = scmp.lt.u32.totalorder %s2315_s11, %s2550_s2  ;;  %p1855_p8 = scmp.lt.u32.totalorder %s1853_s22, %s1849_s20 }
  0x8e   : > { %p1851_p11 = pnand %p1850_p7, %p2603_p0  ;;  %p1857_p6 = scmp.lt.u32.totalorder %s1849_s20, %s2315_s11 }
  0x8f   : > { %p1856_p10 = por %p1855_p8, %p1854_p4 }
  0x90   : > { %p1852_p13 = pneg %p1851_p11 }
  0x91   : > { %p1858_p2 = por %p1857_p6, %p1856_p10 }
  0x93   : > { %p1859_p1 = pnand %p1858_p2, %p1852_p13 }
  0x95   : > { %1862 = shalt.err (!%p1859_p1)
}
  0x96   : > { %s1863_s12 = scalar_lea.vmem %s2317_s21, 2048  ;;  %s2031_s24 = smov [#allocation7]  }
  0x97   : > { %p1864_p5 = scmp.ne.s32.totalorder %s2317_s21, %s1863_s12  ;;  %s1867_s18 = sshll.u32 %s2031_s24, 4  ;;  %s1868_s18 = int_to_ptr.vmem [resolvable:$false] %s1867_s18 }
  0x98   : > { %s1869_s6 = scalar_lea.vmem %s1868_s18, 4096  ;;  %p1870_p9 = scmp.lt.s32.totalorder %s2317_s21, %s1868_s18 }
  0x99   : > { %p1865_p3 = pnand %p1864_p5, %p2603_p0  ;;  %p1871_p7 = scmp.lt.s32.totalorder %s1869_s6, %s1863_s12 }
  0x9b   : > { %p1866_p12 = pneg %p1865_p3  ;;  %p1872_p11 = por %p1871_p7, %p1870_p9 }
  0x9d   : > { %p1873_p4 = pnand %p1872_p11, %p1866_p12 }
  0x9f   : > { %1876 = shalt.err (!%p1873_p4)
}
  0xa0   : > { %s2032_s16 = smov 128   ;;  %s2033_s30 = smov 8  }
  0xa1   : > { %1578 = dma.hbm_to_vmem [thread:$0]  (%p2603_p0), %s2315_s11, 2048, %s2317_s21, %s2319_s0, %s2032_s16, %s2032_s16, %s2033_s30  }
  0xa2 PF: > { %p2604_p13 = scmp.ne.s32.totalorder %s2597_s19, 0 }
  0xa3   : > { %s412_s5 = sand.u32 (!%p2604_p13), 1, %s1999_s27   ;;  %s418_s20 = sand.u32 (!%p2604_p13), 1, %s1991_s25  }
  0xa4   : > { %409 = sbr.rel (%p2604_p13) target bundleno = 743 (0x2e7), region = 81  ;;  %s1340_s13 = sshll.u32 (!%p2604_p13), %s412_s5, 6 }
  0xa5   : > { %s1341_s3 = sshll.u32 (!%p2604_p13), %s418_s20, 6  ;;  %s2347_s22 = scalar_lea.vmem (!%p2604_p13), [#allocation3], %s1340_s13 }
  0xa6   : > { %s419_s14 = scalar_lea.sflag (!%p2604_p13), [#allocation5], %s418_s20  ;;  %s2349_s29 = scalar_lea.vmem (!%p2604_p13), [#allocation4], %s1341_s3 }
  0xa7   : > { %p2605_p8 = scmp.ne.s32.totalorder (!%p2604_p13), %s2587_s17, 0 }
  0xab   : > { %1958 = dma.done.wait (%p2605_p8), %s419_s14, 1024  }
  0xac   : > { %1960 = vsyncadd (%p2605_p8), %s419_s14, 4294966272  ;;  %s2606_s0 = sld [smem:[#allocation16_spill]]  ;;  %s2607_s15 = sld [smem:[#allocation24_spill]] }
  0xad   : > { %s427_s19 = sand.u32 1, %s2140_s10  }
  0xae   : > { %s428_s21 = scalar_lea.sflag [#allocation8], %s427_s19 }
  0xb2   : > { %s429_s11 = sand.u32 1, %s2606_s0   ;;  %p2608_p0 = scmp.ne.s32.totalorder %s2607_s15, 0 }
  0xb3   : > { %s1342_s27 = sshll.u32 %s429_s11, 7 }
  0xb4   : > { %s2359_s12 = scalar_lea.vmem [#allocation7], %s1342_s27 }
  0xb5   : > { %1962 = dma.done.wait (%p2608_p0), %s428_s21, 2048  }
  0xb6   : > { %1964 = vsyncadd (%p2608_p0), %s428_s21, 4294965248  ;;  %p2609_p10 = scmp.eq.s32.totalorder %s2140_s10, 0 }
  0xb8   : > { %1966 = dma.done.wait (%p2609_p10), [#allocation8], 2048   ;;  %p2610_p6 = pmov %p2609_p10 }
  0xb9   : > { %s2611_s17 = sld [smem:[#allocation18_spill]]  ;;  %s2612_s30 = sld [smem:[#allocation28_spill]] }
  0xba   : > { %1968 = vsyncadd (%p2610_p6), [#allocation8], 4294965248  ;;  %s2375_s20 = scalar_lea.vmem [#allocation10], %s1342_s27  ;;  %s2613_s13 = sld [smem:[#allocation17_spill]] }
  0xbf   : > { %s1345_s24 = sshll.u32 %s2611_s17, 4 }
  0xc0   : > { %p482_p2 = scmp.lt.s32.totalorder %s1345_s24, 31  ;;  %p1347_p1 = scmp.ne.s32.totalorder %s2613_s13, 0 }
  0xc1   : > { %v2034_v16 = vmov (!%p1347_p1), 0.0  }
  0xc2   : > { %s2649_s24 = smov (!%p482_p2, %s1345_s24), 31  ;;  %492 = sbr.rel (%p1347_p1) target bundleno = 203 (0xcb), region = 101 }
  0xc3   : > { %s1346_s18 = sshll.u32 %s2649_s24, 3  ;;  %493 = vst [vmem:[#allocation2] sm:$0xff] (!%p1347_p1), %v2034_v16  ;;  %494 = vst [vmem:[#allocation2 + $0x8] sm:$0xff] (!%p1347_p1), %v2034_v16 }
  0xc4   : > { %s2373_s5 = scalar_lea.vmem %s2612_s30, %s1346_s18  ;;  %495 = vst [vmem:[#allocation2 + $0x10] sm:$0xff] (!%p1347_p1), %v2034_v16  ;;  %496 = vst [vmem:[#allocation2 + $0x18] sm:$0xff] (!%p1347_p1), %v2034_v16 }
  0xc5   : > { %497 = vst [vmem:[#allocation2 + $0x20] sm:$0xff] (!%p1347_p1), %v2034_v16  ;;  %498 = vst [vmem:[#allocation2 + $0x28] sm:$0xff] (!%p1347_p1), %v2034_v16 }
  0xc6   : > { %499 = vst [vmem:[#allocation2 + $0x30] sm:$0xff] (!%p1347_p1), %v2034_v16  ;;  %500 = vst [vmem:[#allocation2 + $0x38] sm:$0xff] (!%p1347_p1), %v2034_v16 }
  0xc7   : > { %501 = vst [vmem:[#allocation2 + $0x40] sm:$0xff] (!%p1347_p1), %v2034_v16  ;;  %502 = vst [vmem:[#allocation2 + $0x48] sm:$0xff] (!%p1347_p1), %v2034_v16 }
  0xc8   : > { %503 = vst [vmem:[#allocation2 + $0x50] sm:$0xff] (!%p1347_p1), %v2034_v16  ;;  %504 = vst [vmem:[#allocation2 + $0x58] sm:$0xff] (!%p1347_p1), %v2034_v16 }
  0xc9   : > { %505 = vst [vmem:[#allocation2 + $0x60] sm:$0xff] %v2034_v16  ;;  %506 = vst [vmem:[#allocation2 + $0x68] sm:$0xff] %v2034_v16 }
  0xca   : > { %507 = vst [vmem:[#allocation2 + $0x70] sm:$0xff] %v2034_v16  ;;  %508 = vst [vmem:[#allocation2 + $0x78] sm:$0xff] %v2034_v16 }
  0xcb PF: > { %v1711_v17 = vld [vmem:[%s2349_s29] sm:$0xff]   ;;  %v1712_v18 = vld [vmem:[%s2349_s29 + $0x8] sm:$0xff]   ;;  %v1713_v19 = vld [vmem:[%s2349_s29 + $0x10] sm:$0xff]   ;;  %s2614_s10 = sld [smem:[#allocation17_spill]] }
  0xcc   : > { %1423 = vmatprep.subr.bf16.mxu0 %v1711_v17  ;;  %1543 = vmatprep.subr.bf16.mxu1 %v1711_v17  ;;  %v1714_v20 = vld [vmem:[%s2349_s29 + $0x18] sm:$0xff]   ;;  %v1719_v21 = vld [vmem:[%s2347_s22] sm:$0xff]   ;;  %v1716_v24 = vld [vmem:[%s2349_s29 + $0x28] sm:$0xff]  }
  0xcd   : > { %1424 = vmatpush3.bf16.msra.mxu0 %v1711_v17  ;;  %1551 = vmatpush3.bf16.msra.mxu1 %v1711_v17  ;;  %v1720_v22 = vld [vmem:[%s2347_s22 + $0x20] sm:$0xff]   ;;  %v1717_v25 = vld [vmem:[%s2349_s29 + $0x30] sm:$0xff]   ;;  %v1718_v26 = vld [vmem:[%s2349_s29 + $0x38] sm:$0xff]  }
  0xce   : > { %1425 = vmatprep.subr.bf16.mxu0 %v1712_v18  ;;  %1544 = vmatprep.subr.bf16.mxu1 %v1712_v18  ;;  %v1715_v23 = vld [vmem:[%s2349_s29 + $0x20] sm:$0xff]   ;;  %v1721_v27 = vld [vmem:[%s2347_s22 + $0x8] sm:$0xff]   ;;  %v1723_v29 = vld [vmem:[%s2347_s22 + $0x10] sm:$0xff]  }
  0xcf   : > { %1439 = vmatprep.mubr.bf16.mxu0 %v1719_v21  ;;  %1447 = vmatprep.mubr.bf16.mxu1 %v1720_v22  ;;  %v1722_v28 = vld [vmem:[%s2347_s22 + $0x28] sm:$0xff]   ;;  %v1724_v30 = vld [vmem:[%s2347_s22 + $0x30] sm:$0xff]   ;;  %v1725_v31 = vld [vmem:[%s2347_s22 + $0x18] sm:$0xff]  }
  0xd0   : > { %v1726_v32 = vld [vmem:[%s2347_s22 + $0x38] sm:$0xff]   ;;  %v511_v33 = vld [vmem:[#allocation2 + $0x10] sm:$0xff]  ;;  %v509_v35 = vld [vmem:[#allocation2] sm:$0xff] }
  0xd1   : > { %1426 = vmatpush3.bf16.msra.mxu0 %v1712_v18  ;;  %1552 = vmatpush3.bf16.msra.mxu1 %v1712_v18  ;;  %v519_v34 = vld [vmem:[#allocation2 + $0x50] sm:$0xff]  ;;  %v517_v36 = vld [vmem:[#allocation2 + $0x40] sm:$0xff]  ;;  %v512_v39 = vld [vmem:[#allocation2 + $0x18] sm:$0xff]  ;;  %p1364_p5 = scmp.ne.s32.totalorder %s2614_s10, 1 }
  0xd2   : > { %1427 = vmatprep.subr.bf16.mxu0 %v1713_v19  ;;  %1545 = vmatprep.subr.bf16.mxu1 %v1713_v19  ;;  %v520_v40 = vld [vmem:[#allocation2 + $0x58] sm:$0xff]  ;;  %v510_v45 = vld [vmem:[#allocation2 + $0x8] sm:$0xff]  ;;  %v515_v57 = vld [vmem:[#allocation2 + $0x30] sm:$0xff]  ;;  %v2035_v22 = vmov (!%p1364_p5), 0   ;;  %s2615_s14 = sld [smem:[#allocation29_spill]] (!%p1364_p5) }
  0xd3   : > { %v518_v46 = vld [vmem:[#allocation2 + $0x48] sm:$0xff]  ;;  %v523_v58 = vld [vmem:[#allocation2 + $0x70] sm:$0xff]  ;;  %v513_v59 = vld [vmem:[#allocation2 + $0x20] sm:$0xff]  ;;  %1728 = vset.pattern.permute.xlu1 (!%p1364_p5), %v2035_v22  ;;  %1727 = vset.pattern.permute.xlu0 (!%p1364_p5), %v2035_v22 }
  0xd4   : > { %v521_v60 = vld [vmem:[#allocation2 + $0x60] sm:$0xff]  ;;  %v516_v63 = vld [vmem:[#allocation2 + $0x38] sm:$0xff]  ;;  %v514_v5 = vld [vmem:[#allocation2 + $0x28] sm:$0xff] }
  0xd5   : > { %1428 = vmatpush3.bf16.msra.mxu0 %v1713_v19  ;;  %1553 = vmatpush3.bf16.msra.mxu1 %v1713_v19  ;;  %v524_v0 = vld [vmem:[#allocation2 + $0x78] sm:$0xff]  ;;  %v522_v6 = vld [vmem:[#allocation2 + $0x68] sm:$0xff]  ;;  %v834_v17 = vld [vmem:[#allocation9] sm:$0xff] (!%p1364_p5) }
  0xd6   : > { %1429 = vmatprep.subr.bf16.mxu0 %v1714_v20  ;;  %1546 = vmatprep.subr.bf16.mxu1 %v1714_v20  ;;  %v835_v18 = vld [vmem:[#allocation9 + $0x8] sm:$0xff] (!%p1364_p5)  ;;  %v836_v19 = vld [vmem:[#allocation9 + $0x10] sm:$0xff] (!%p1364_p5)  ;;  %v837_v21 = vld [vmem:[#allocation9 + $0x18] sm:$0xff] (!%p1364_p5) }
  0xd9   : > { %1430 = vmatpush3.bf16.msra.mxu0 %v1714_v20  ;;  %1554 = vmatpush3.bf16.msra.mxu1 %v1714_v20  ;;  %v1511_v20 = vpack.c.bf16 (!%p1364_p5), %v835_v18, %v834_v17  ;;  %v807_v17 = vld [vmem:[%s2359_s12 + $0x28] sm:$0xff] (!%p1364_p5)  ;;  %v1013_v18 = vld [vmem:[%s2373_s5 + $0x58] sm:$0xff] (!%p1364_p5) }
  0xda   : > { %1431 = vmatprep.subr.bf16.mxu0 %v1715_v23  ;;  %1547 = vmatprep.subr.bf16.mxu1 %v1715_v23 }
  0xdd   : > { %1432 = vmatpush3.bf16.msra.mxu0 %v1715_v23  ;;  %1555 = vmatpush3.bf16.msra.mxu1 %v1715_v23  ;;  %v1515_v23 = vpack.c.bf16 (!%p1364_p5), %v837_v21, %v836_v19  ;;  %v1012_v19 = vld [vmem:[%s2373_s5 + $0x50] sm:$0xff] (!%p1364_p5) }
  0xde   : > { %1433 = vmatprep.subr.bf16.mxu0 %v1716_v24  ;;  %1548 = vmatprep.subr.bf16.mxu1 %v1716_v24 }
  0xe1   : > { %1434 = vmatpush3.bf16.msra.mxu0 %v1716_v24  ;;  %1556 = vmatpush3.bf16.msra.mxu1 %v1716_v24  ;;  %v838_v24 = vld [vmem:[#allocation9 + $0x20] sm:$0xff] (!%p1364_p5) }
  0xe2   : > { %1435 = vmatprep.subr.bf16.mxu0 %v1717_v25  ;;  %1549 = vmatprep.subr.bf16.mxu1 %v1717_v25 }
  0xe5   : > { %1436 = vmatpush3.bf16.msra.mxu0 %v1717_v25  ;;  %1557 = vmatpush3.bf16.msra.mxu1 %v1717_v25  ;;  %v839_v25 = vld [vmem:[#allocation9 + $0x28] sm:$0xff] (!%p1364_p5) }
  0xe6   : > { %1437 = vmatprep.subr.bf16.mxu0 %v1718_v26  ;;  %1550 = vmatprep.subr.bf16.mxu1 %v1718_v26 }
  0xe9   : > { %1438 = vmatpush3.bf16.msra.mxu0 %v1718_v26  ;;  %1558 = vmatpush3.bf16.msra.mxu1 %v1718_v26  ;;  %v1519_v26 = vpack.c.bf16 (!%p1364_p5), %v839_v25, %v838_v24  ;;  %v808_v25 = vld [vmem:[%s2359_s12 + $0x30] sm:$0xff] (!%p1364_p5) }
  0xea   : > { %1512 = vmatprep.subr.bf16.mxu0 (!%p1364_p5), %v1511_v20  ;;  %1559 = vmatprep.subr.bf16.mxu1 (!%p1364_p5), %v1511_v20 }
  0xec   : > { %1440 = vmatmul.mubr.bf16.vlgmr.msra.gmra.mrb[0].mxu0 %v1721_v27  ;;  %1448 = vmatmul.mubr.bf16.vlgmr.msra.gmra.mrb[0].mxu1 %v1722_v28  ;;  %v840_v27 = vld [vmem:[#allocation9 + $0x30] sm:$0xff] (!%p1364_p5) }
  0xed   : > { %1443 = vmatprep.mubr.bf16.mxu0 %v1723_v29  ;;  %1451 = vmatprep.mubr.bf16.mxu1 %v1724_v30  ;;  %v802_v29 = vld [vmem:[%s2359_s12] sm:$0xff] (!%p1364_p5)  ;;  %v841_v30 = vld [vmem:[#allocation9 + $0x38] sm:$0xff] (!%p1364_p5) }
  0xee   : > { %1514 = vmatpush3.bf16.msra.mxu0 (!%p1364_p5), %v1511_v20  ;;  %1567 = vmatpush3.bf16.msra.mxu1 (!%p1364_p5), %v1511_v20 }
  0xef   : > { %1516 = vmatprep.subr.bf16.mxu0 (!%p1364_p5), %v1515_v23  ;;  %1560 = vmatprep.subr.bf16.mxu1 (!%p1364_p5), %v1515_v23 }
  0xf2   : > { %1518 = vmatpush3.bf16.msra.mxu0 (!%p1364_p5), %v1515_v23  ;;  %1568 = vmatpush3.bf16.msra.mxu1 (!%p1364_p5), %v1515_v23  ;;  %v815_v23 = vld [vmem:[%s2359_s12 + $0x68] sm:$0xff] (!%p1364_p5) }
  0xf3   : > { %1520 = vmatprep.subr.bf16.mxu0 (!%p1364_p5), %v1519_v26  ;;  %1561 = vmatprep.subr.bf16.mxu1 (!%p1364_p5), %v1519_v26 }
  0xf4   : > { %1444 = vmatmul.mubr.bf16.gmra.mrb[4].mxu0 %v1725_v31  ;;  %1452 = vmatmul.mubr.bf16.gmra.mrb[4].mxu1 %v1726_v32 }
  0xf6   : > { %1522 = vmatpush3.bf16.msra.mxu0 (!%p1364_p5), %v1519_v26  ;;  %1569 = vmatpush3.bf16.msra.mxu1 (!%p1364_p5), %v1519_v26 }
 0x1bf   : > { %v1441_v37 = vpop.f32.mrb[0].mxu0  ;;  %v1449_v38 = vpop.f32.mrb[0].mxu1 }
 0x1c0   : > { %v752_v41 = vadd.f32 %v1441_v37, %v511_v33  ;;  %v760_v42 = vadd.f32 %v1449_v38, %v519_v34  ;;  %v687_v43 = vpop.f32.mrb[1].mxu0  ;;  %v719_v44 = vpop.f32.mrb[1].mxu1  ;;  %v810_v33 = vld [vmem:[%s2359_s12 + $0x40] sm:$0xff] (!%p1364_p5)  ;;  %v843_v37 = vld [vmem:[#allocation9 + $0x48] sm:$0xff] (!%p1364_p5) }
 0x1c1   : > { %v750_v47 = vadd.f32 %v687_v43, %v509_v35  ;;  %v758_v48 = vadd.f32 %v719_v44, %v517_v36  ;;  %v1442_v49 = vpop.f32.mrb[2].mxu0  ;;  %v1450_v50 = vpop.f32.mrb[2].mxu1  ;;  %v1523_v35 = vpack.c.bf16 (!%p1364_p5), %v841_v30, %v840_v27  ;;  %v842_v36 = vld [vmem:[#allocation9 + $0x40] sm:$0xff] (!%p1364_p5)  ;;  %v816_v27 = vld [vmem:[%s2359_s12 + $0x70] sm:$0xff] (!%p1364_p5) }
 0x1c2   : > { %768 = vst [vmem:[#allocation2 + $0x10] sm:$0xff] %v752_v41  ;;  %776 = vst [vmem:[#allocation2 + $0x50] sm:$0xff] %v760_v42  ;;  %v753_v51 = vadd.f32 %v1442_v49, %v512_v39  ;;  %v761_v52 = vadd.f32 %v1450_v50, %v520_v40  ;;  %v690_v53 = vpop.f32.mrb[3].mxu0  ;;  %v722_v54 = vpop.f32.mrb[3].mxu1  ;;  %v1527_v38 = vpack.c.bf16 (!%p1364_p5), %v843_v37, %v842_v36  ;;  %v844_v39 = vld [vmem:[#allocation9 + $0x50] sm:$0xff] (!%p1364_p5)  ;;  %v845_v40 = vld [vmem:[#allocation9 + $0x58] sm:$0xff] (!%p1364_p5) }
 0x1c3   : > { %766 = vst [vmem:[#allocation2] sm:$0xff] %v750_v47  ;;  %774 = vst [vmem:[#allocation2 + $0x40] sm:$0xff] %v758_v48  ;;  %v751_v55 = vadd.f32 %v690_v53, %v510_v45  ;;  %v759_v56 = vadd.f32 %v722_v54, %v518_v46  ;;  %1524 = vmatprep.subr.bf16.mxu0 (!%p1364_p5), %v1523_v35  ;;  %1562 = vmatprep.subr.bf16.mxu1 (!%p1364_p5), %v1523_v35  ;;  %v1004_v41 = vld [vmem:[%s2373_s5 + $0x10] sm:$0xff] (!%p1364_p5)  ;;  %v1002_v42 = vld [vmem:[%s2373_s5] sm:$0xff] (!%p1364_p5) }
 0x1c4   : > { %769 = vst [vmem:[#allocation2 + $0x18] sm:$0xff] %v753_v51  ;;  %777 = vst [vmem:[#allocation2 + $0x58] sm:$0xff] %v761_v52  ;;  %1526 = vmatpush3.bf16.msra.mxu0 (!%p1364_p5), %v1523_v35  ;;  %1570 = vmatpush3.bf16.msra.mxu1 (!%p1364_p5), %v1523_v35  ;;  %v1531_v43 = vpack.c.bf16 (!%p1364_p5), %v845_v40, %v844_v39  ;;  %v846_v44 = vld [vmem:[#allocation9 + $0x60] sm:$0xff] (!%p1364_p5)  ;;  %v847_v45 = vld [vmem:[#allocation9 + $0x68] sm:$0xff] (!%p1364_p5) }
 0x1c5   : > { %767 = vst [vmem:[#allocation2 + $0x8] sm:$0xff] %v751_v55  ;;  %775 = vst [vmem:[#allocation2 + $0x48] sm:$0xff] %v759_v56  ;;  %1528 = vmatprep.subr.bf16.mxu0 (!%p1364_p5), %v1527_v38  ;;  %1563 = vmatprep.subr.bf16.mxu1 (!%p1364_p5), %v1527_v38  ;;  %v1005_v46 = vld [vmem:[%s2373_s5 + $0x18] sm:$0xff] (!%p1364_p5)  ;;  %v1003_v47 = vld [vmem:[%s2373_s5 + $0x8] sm:$0xff] (!%p1364_p5)  ;;  %v1535_v48 = vpack.c.bf16 (!%p1364_p5), %v847_v45, %v846_v44 }
 0x1c6   : > { %1030 = vperm.xlu1 (!%p1364_p5), %1728, %v1004_v41   ;;  %1020 = vperm.xlu0 (!%p1364_p5), %1727, %v1002_v42   ;;  %v848_v49 = vld [vmem:[#allocation9 + $0x70] sm:$0xff] (!%p1364_p5)  ;;  %v849_v50 = vld [vmem:[#allocation9 + $0x78] sm:$0xff] (!%p1364_p5)  ;;  %v1007_v51 = vld [vmem:[%s2373_s5 + $0x28] sm:$0xff] (!%p1364_p5) }
 0x1c7   : > { %v1445_v61 = vpop.f32.mrb[4].mxu0  ;;  %v1453_v62 = vpop.f32.mrb[4].mxu1  ;;  %785 = sbr.rel (%p1364_p5) target bundleno = 715 (0x2cb), region = 105  ;;  %v1006_v52 = vld [vmem:[%s2373_s5 + $0x20] sm:$0xff] (!%p1364_p5)  ;;  %v1539_v53 = vpack.c.bf16 (!%p1364_p5), %v849_v50, %v848_v49  ;;  %v803_v55 = vld [vmem:[%s2359_s12 + $0x8] sm:$0xff] (!%p1364_p5)  ;;  %v1009_v56 = vld [vmem:[%s2373_s5 + $0x38] sm:$0xff] (!%p1364_p5) }
 0x1c8   : > { %v756_v1 = vadd.f32 %v1445_v61, %v515_v57  ;;  %v764_v2 = vadd.f32 %v1453_v62, %v523_v58  ;;  %v703_v3 = vpop.f32.mrb[5].mxu0  ;;  %v735_v4 = vpop.f32.mrb[5].mxu1  ;;  %1530 = vmatpush3.bf16.msra.mxu0 (!%p1364_p5), %v1527_v38  ;;  %1571 = vmatpush3.bf16.msra.mxu1 (!%p1364_p5), %v1527_v38  ;;  %v1008_v57 = vld [vmem:[%s2373_s5 + $0x30] sm:$0xff] (!%p1364_p5)  ;;  %v809_v35 = vld [vmem:[%s2359_s12 + $0x38] sm:$0xff] (!%p1364_p5) }
 0x1c9   : > { %v754_v7 = vadd.f32 %v703_v3, %v513_v59  ;;  %v762_v8 = vadd.f32 %v735_v4, %v521_v60  ;;  %v1446_v9 = vpop.f32.mrb[6].mxu0  ;;  %v1454_v10 = vpop.f32.mrb[6].mxu1  ;;  %1532 = vmatprep.subr.bf16.mxu0 (!%p1364_p5), %v1531_v43  ;;  %1564 = vmatprep.subr.bf16.mxu1 (!%p1364_p5), %v1531_v43  ;;  %v811_v59 = vld [vmem:[%s2359_s12 + $0x48] sm:$0xff] (!%p1364_p5)  ;;  %v788_v60 = vld [vmem:[#allocation2 + $0x10] sm:$0xff] (!%p1364_p5)  ;;  %v805_v3 = vld [vmem:[%s2359_s12 + $0x18] sm:$0xff] (!%p1364_p5) }
 0x1ca   : > { %772 = vst [vmem:[#allocation2 + $0x30] sm:$0xff] %v756_v1  ;;  %780 = vst [vmem:[#allocation2 + $0x70] sm:$0xff] %v764_v2  ;;  %v757_v11 = vadd.f32 %v1446_v9, %v516_v63  ;;  %v765_v12 = vadd.f32 %v1454_v10, %v524_v0  ;;  %v706_v13 = vpop.f32.mrb[7].mxu0  ;;  %v738_v14 = vpop.f32.mrb[7].mxu1  ;;  %v786_v28 = vld [vmem:[#allocation2] sm:$0xff] (!%p1364_p5)  ;;  %1035 = vperm.xlu1 (!%p1364_p5), %1728, %v1005_v46   ;;  %1025 = vperm.xlu0 (!%p1364_p5), %1727, %v1003_v47   ;;  %v804_v61 = vld [vmem:[%s2359_s12 + $0x10] sm:$0xff] (!%p1364_p5) }
 0x1cb   : > { %770 = vst [vmem:[#allocation2 + $0x20] sm:$0xff] %v754_v7  ;;  %778 = vst [vmem:[#allocation2 + $0x60] sm:$0xff] %v762_v8  ;;  %v755_v15 = vadd.f32 %v706_v13, %v514_v5  ;;  %v763_v16 = vadd.f32 %v738_v14, %v522_v6  ;;  %v818_v31 = vadd.f32 (!%p1364_p5), %v802_v29, %v786_v28  ;;  %v794_v32 = vld [vmem:[#allocation2 + $0x40] sm:$0xff] (!%p1364_p5)  ;;  %v796_v62 = vld [vmem:[#allocation2 + $0x50] sm:$0xff] (!%p1364_p5) }
 0x1cc   : > { %773 = vst [vmem:[#allocation2 + $0x38] sm:$0xff] %v757_v11  ;;  %781 = vst [vmem:[#allocation2 + $0x78] sm:$0xff] %v765_v12  ;;  %v826_v34 = vadd.f32 (!%p1364_p5), %v810_v33, %v794_v32  ;;  %1534 = vmatpush3.bf16.msra.mxu0 (!%p1364_p5), %v1531_v43  ;;  %1572 = vmatpush3.bf16.msra.mxu1 (!%p1364_p5), %v1531_v43  ;;  %v787_v54 = vld [vmem:[#allocation2 + $0x8] sm:$0xff] (!%p1364_p5)  ;;  %v812_v63 = vld [vmem:[%s2359_s12 + $0x50] sm:$0xff] (!%p1364_p5)  ;;  %v820_v6 = vadd.f32 (!%p1364_p5), %v804_v61, %v788_v60 }
 0x1cd   : > { %771 = vst [vmem:[#allocation2 + $0x28] sm:$0xff] %v755_v15  ;;  %779 = vst [vmem:[#allocation2 + $0x68] sm:$0xff] %v763_v16  ;;  %1487 = vmatprep.mubr.f32.mxu0 (!%p1364_p5), %v818_v31  ;;  %1536 = vmatprep.subr.bf16.mxu0 (!%p1364_p5), %v1535_v48  ;;  %v795_v58 = vld [vmem:[#allocation2 + $0x48] sm:$0xff] (!%p1364_p5)  ;;  %v789_v0 = vld [vmem:[#allocation2 + $0x18] sm:$0xff] (!%p1364_p5)  ;;  %v819_v1 = vadd.f32 (!%p1364_p5), %v803_v55, %v787_v54  ;;  %v828_v7 = vadd.f32 (!%p1364_p5), %v812_v63, %v796_v62 }
 0x1ce   : > { %1499 = vmatprep.mubr.f32.mxu1 %v826_v34  ;;  %1565 = vmatprep.subr.bf16.mxu1 %v1535_v48  ;;  %v827_v2 = vadd.f32 %v811_v59, %v795_v58  ;;  %v1011_v4 = vld [vmem:[%s2373_s5 + $0x48] sm:$0xff]  ;;  %v1010_v5 = vld [vmem:[%s2373_s5 + $0x40] sm:$0xff]  ;;  %v797_v8 = vld [vmem:[#allocation2 + $0x58] sm:$0xff]  ;;  %v821_v15 = vadd.f32 %v805_v3, %v789_v0 }
 0x1cf   : > { %1045 = vperm.xlu1 %1728, %v1007_v51   ;;  %1040 = vperm.xlu0 %1727, %v1006_v52   ;;  %v813_v9 = vld [vmem:[%s2359_s12 + $0x58] sm:$0xff]  ;;  %v806_v11 = vld [vmem:[%s2359_s12 + $0x20] sm:$0xff]  ;;  %v1015_v31 = vld [vmem:[%s2373_s5 + $0x68] sm:$0xff] }
 0x1d0   : > { %1538 = vmatpush3.bf16.msra.mxu0 %v1535_v48  ;;  %1573 = vmatpush3.bf16.msra.mxu1 %v1535_v48  ;;  %v814_v13 = vld [vmem:[%s2359_s12 + $0x60] sm:$0xff]  ;;  %v829_v16 = vadd.f32 %v813_v9, %v797_v8  ;;  %v817_v37 = vld [vmem:[%s2359_s12 + $0x78] sm:$0xff]  ;;  %v1016_v41 = vld [vmem:[%s2373_s5 + $0x70] sm:$0xff] }
 0x1d1   : > { %1540 = vmatprep.subr.bf16.mxu0 %v1539_v53  ;;  %1566 = vmatprep.subr.bf16.mxu1 %v1539_v53  ;;  %v792_v24 = vld [vmem:[#allocation2 + $0x30] sm:$0xff]  ;;  %v1014_v32 = vld [vmem:[%s2373_s5 + $0x60] sm:$0xff]  ;;  %v1017_v40 = vld [vmem:[%s2373_s5 + $0x78] sm:$0xff] }
 0x1d2   : > { %v790_v10 = vld [vmem:[#allocation2 + $0x20] sm:$0xff]  ;;  %v800_v26 = vld [vmem:[#allocation2 + $0x70] sm:$0xff]  ;;  %v824_v33 = vadd.f32 %v808_v25, %v792_v24 }
 0x1d3   : > { %1055 = vperm.xlu1 %1728, %v1009_v56   ;;  %1050 = vperm.xlu0 %1727, %v1008_v57   ;;  %v798_v12 = vld [vmem:[#allocation2 + $0x60] sm:$0xff]  ;;  %v822_v20 = vadd.f32 %v806_v11, %v790_v10  ;;  %v793_v30 = vld [vmem:[#allocation2 + $0x38] sm:$0xff]  ;;  %v832_v34 = vadd.f32 %v816_v27, %v800_v26 }
 0x1d4   : > { %1542 = vmatpush3.bf16.msra.mxu0 %v1539_v53  ;;  %1574 = vmatpush3.bf16.msra.mxu1 %v1539_v53  ;;  %v791_v14 = vld [vmem:[#allocation2 + $0x28] sm:$0xff]  ;;  %v830_v21 = vadd.f32 %v814_v13, %v798_v12  ;;  %v801_v36 = vld [vmem:[#allocation2 + $0x78] sm:$0xff]  ;;  %v825_v38 = vadd.f32 %v809_v35, %v793_v30  ;;  %v2430_v56 = vld [vmem:[%s2615_s14] ss:$0 sm:$0xff] }
 0x1d5   : > { %v799_v22 = vld [vmem:[#allocation2 + $0x68] sm:$0xff]  ;;  %v823_v28 = vadd.f32 %v807_v17, %v791_v14  ;;  %v833_v39 = vadd.f32 %v817_v37, %v801_v36 }
 0x1d6   : > { %v831_v29 = vadd.f32 %v815_v23, %v799_v22 }
 0x1d7   : > { %1065 = vperm.xlu1 %1728, %v1011_v4   ;;  %1060 = vperm.xlu0 %1727, %v1010_v5  }
 0x1d8   : > { %1488 = vmatmul.mubr.f32.vlgmr.msra.gmra.mrb[0].mxu0 %v819_v1  ;;  %1500 = vmatmul.mubr.f32.vlgmr.msra.gmra.mrb[0].mxu1 %v827_v2 }
 0x1d9   : > { %1490 = vmatprep.mubr.f32.mxu0 %v820_v6  ;;  %1502 = vmatprep.mubr.f32.mxu1 %v828_v7 }
 0x1db   : > { %1075 = vperm.xlu1 %1728, %v1013_v18   ;;  %1070 = vperm.xlu0 %1727, %v1012_v19  }
 0x1dc   : > { %1491 = vmatmul.mubr.f32.gmra.mrb[2].mxu0 %v821_v15  ;;  %1503 = vmatmul.mubr.f32.gmra.mrb[2].mxu1 %v829_v16 }
 0x1dd   : > { %1493 = vmatprep.mubr.f32.mxu0 %v822_v20  ;;  %1505 = vmatprep.mubr.f32.mxu1 %v830_v21 }
 0x1df   : > { %1085 = vperm.xlu1 %1728, %v1015_v31   ;;  %1080 = vperm.xlu0 %1727, %v1014_v32  }
 0x1e0   : > { %1494 = vmatmul.mubr.f32.gmra.mrb[4].mxu0 %v823_v28  ;;  %1506 = vmatmul.mubr.f32.gmra.mrb[4].mxu1 %v831_v29 }
 0x1e1   : > { %1496 = vmatprep.mubr.f32.mxu0 %v824_v33  ;;  %1508 = vmatprep.mubr.f32.mxu1 %v832_v34 }
 0x1e3   : > { %1095 = vperm.xlu1 %1728, %v1017_v40   ;;  %1090 = vperm.xlu0 %1727, %v1016_v41  }
 0x1e4   : > { %1497 = vmatmul.mubr.f32.gmra.mrb[6].mxu0 %v825_v38  ;;  %1509 = vmatmul.mubr.f32.gmra.mrb[6].mxu1 %v833_v39 }
 0x245   : > { %v1031_v42 = vpop.permute.xlu1 %1030  ;;  %v1021_v43 = vpop.permute.xlu0 %1020 }
 0x246   : > { %1729 = vrcp.f32 %v1031_v42 }
 0x247   : > { %1731 = vrcp.f32 %v1021_v43 }
 0x249   : > { %v1036_v44 = vpop.permute.xlu1 %1035  ;;  %v1026_v45 = vpop.permute.xlu0 %1025 }
 0x24a   : > { %1733 = vrcp.f32 %v1026_v45 }
 0x24e   : > { %v1046_v46 = vpop.permute.xlu1 %1045  ;;  %v1041_v47 = vpop.permute.xlu0 %1040 }
 0x250   : > { %v1730_v57 = vpop.eup %1729 }
 0x251   : > { %v1732_v60 = vpop.eup %1731 }
 0x252   : > { %v1056_v48 = vpop.permute.xlu1 %1055  ;;  %v1051_v49 = vpop.permute.xlu0 %1050 }
 0x254   : > { %v1734_v63 = vpop.eup %1733 }
 0x256   : > { %v1066_v50 = vpop.permute.xlu1 %1065  ;;  %v1061_v51 = vpop.permute.xlu0 %1060 }
 0x257   : > { %1735 = vrcp.f32 %v1066_v50 }
 0x258   : > { %1737 = vrcp.f32 %v1061_v51 }
 0x259   : > { %1739 = vrcp.f32 %v1036_v44 }
 0x25a   : > { %v1076_v52 = vpop.permute.xlu1 %1075  ;;  %v1071_v53 = vpop.permute.xlu0 %1070  ;;  %1741 = vrcp.f32 %v1046_v46 }
 0x25b   : > { %1743 = vrcp.f32 %v1076_v52 }
 0x25c   : > { %1745 = vrcp.f32 %v1071_v53 }
 0x25d   : > { %1747 = vrcp.f32 %v1041_v47 }
 0x25e   : > { %v1086_v54 = vpop.permute.xlu1 %1085  ;;  %v1081_v55 = vpop.permute.xlu0 %1080  ;;  %1749 = vrcp.f32 %v1056_v48 }
 0x25f   : > { %1751 = vrcp.f32 %v1086_v54 }
 0x260   : > { %1753 = vrcp.f32 %v1081_v55 }
 0x261   : > { %v1736_v4 = vpop.eup %1735  ;;  %1755 = vrcp.f32 %v1051_v49 }
 0x262   : > { %v1096_v58 = vpop.permute.xlu1 %1095  ;;  %v1091_v59 = vpop.permute.xlu0 %1090 }
 0x263   : > { %v1738_v7 = vpop.eup %1737  ;;  %1757 = vrcp.f32 %v1096_v58 }
 0x264   : > { %v1740_v10 = vpop.eup %1739  ;;  %1759 = vrcp.f32 %v1091_v59 }
 0x265   : > { %v1742_v15 = vpop.eup %1741 }
 0x266   : > { %v1744_v20 = vpop.eup %1743 }
 0x267   : > { %v1746_v23 = vpop.eup %1745 }
 0x268   : > { %v1748_v26 = vpop.eup %1747 }
 0x269   : > { %v1750_v31 = vpop.eup %1749 }
 0x26a   : > { %v1752_v36 = vpop.eup %1751 }
 0x26b   : > { %v1754_v39 = vpop.eup %1753 }
 0x26c   : > { %v1756_v42 = vpop.eup %1755 }
 0x26d   : > { %v1758_v47 = vpop.eup %1757 }
 0x26e   : > { %v1760_v52 = vpop.eup %1759 }
 0x2ab   : > { %v1489_v61 = vpop.f32.mrb[0].mxu0  ;;  %v1501_v62 = vpop.f32.mrb[0].mxu1 }
 0x2ac   : > { %v929_v0 = vadd.f32 %v1489_v61, %v2430_v56  ;;  %v969_v1 = vadd.f32 %v1501_v62, %v2430_v56  ;;  %v923_v2 = vpop.f32.mrb[1].mxu0  ;;  %v963_v3 = vpop.f32.mrb[1].mxu1 }
 0x2ad   : > { %v924_v5 = vadd.f32 %v2430_v56, %v923_v2  ;;  %v964_v6 = vadd.f32 %v2430_v56, %v963_v3 }
 0x2ae   : > { %v1101_v8 = vmul.f32 %v1734_v63, %v929_v0  ;;  %v1117_v9 = vmul.f32 %v1736_v4, %v969_v1 }
 0x2af   : > { %v1099_v11 = vmul.f32 %v1732_v60, %v924_v5  ;;  %v1115_v12 = vmul.f32 %v1738_v7, %v964_v6  ;;  %v1492_v13 = vpop.f32.mrb[2].mxu0  ;;  %v1504_v14 = vpop.f32.mrb[2].mxu1 }
 0x2b0   : > { %1761 = vtanh.f32 %v1101_v8  ;;  %v939_v16 = vadd.f32 %v1492_v13, %v2430_v56  ;;  %v979_v17 = vadd.f32 %v1504_v14, %v2430_v56  ;;  %v933_v18 = vpop.f32.mrb[3].mxu0  ;;  %v973_v19 = vpop.f32.mrb[3].mxu1 }
 0x2b1   : > { %1763 = vtanh.f32 %v1117_v9  ;;  %v934_v21 = vadd.f32 %v2430_v56, %v933_v18  ;;  %v974_v22 = vadd.f32 %v2430_v56, %v973_v19 }
 0x2b2   : > { %1765 = vtanh.f32 %v1099_v11  ;;  %v1105_v24 = vmul.f32 %v1740_v10, %v939_v16  ;;  %v1121_v25 = vmul.f32 %v1744_v20, %v979_v17 }
 0x2b3   : > { %1767 = vtanh.f32 %v1115_v12  ;;  %v1103_v27 = vmul.f32 %v1730_v57, %v934_v21  ;;  %v1119_v28 = vmul.f32 %v1746_v23, %v974_v22  ;;  %v1495_v29 = vpop.f32.mrb[4].mxu0  ;;  %v1507_v30 = vpop.f32.mrb[4].mxu1 }
 0x2b4   : > { %1769 = vtanh.f32 %v1105_v24  ;;  %v949_v32 = vadd.f32 %v1495_v29, %v2430_v56  ;;  %v989_v33 = vadd.f32 %v1507_v30, %v2430_v56  ;;  %v943_v34 = vpop.f32.mrb[5].mxu0  ;;  %v983_v35 = vpop.f32.mrb[5].mxu1 }
 0x2b5   : > { %1771 = vtanh.f32 %v1121_v25  ;;  %v944_v37 = vadd.f32 %v2430_v56, %v943_v34  ;;  %v984_v38 = vadd.f32 %v2430_v56, %v983_v35 }
 0x2b6   : > { %1773 = vtanh.f32 %v1103_v27  ;;  %v1109_v40 = vmul.f32 %v1742_v15, %v949_v32  ;;  %v1125_v41 = vmul.f32 %v1752_v36, %v989_v33 }
 0x2b7   : > { %1775 = vtanh.f32 %v1119_v28  ;;  %v1107_v43 = vmul.f32 %v1748_v26, %v944_v37  ;;  %v1123_v44 = vmul.f32 %v1754_v39, %v984_v38  ;;  %v1498_v45 = vpop.f32.mrb[6].mxu0  ;;  %v1510_v46 = vpop.f32.mrb[6].mxu1 }
 0x2b8   : > { %1777 = vtanh.f32 %v1109_v40  ;;  %v959_v48 = vadd.f32 %v1498_v45, %v2430_v56  ;;  %v999_v49 = vadd.f32 %v1510_v46, %v2430_v56  ;;  %v953_v50 = vpop.f32.mrb[7].mxu0  ;;  %v993_v51 = vpop.f32.mrb[7].mxu1 }
 0x2b9   : > { %1779 = vtanh.f32 %v1125_v41  ;;  %v954_v53 = vadd.f32 %v2430_v56, %v953_v50  ;;  %v994_v54 = vadd.f32 %v2430_v56, %v993_v51 }
 0x2ba   : > { %v1762_v55 = vpop.eup %1761  ;;  %1781 = vtanh.f32 %v1107_v43  ;;  %v1113_v57 = vmul.f32 %v1750_v31, %v959_v48  ;;  %v1129_v58 = vmul.f32 %v1758_v47, %v999_v49 }
 0x2bb   : > { %v1764_v59 = vpop.eup %1763  ;;  %1147 = vst [vmem:[%s2375_s20 + $0x8] sm:$0xff] %v1762_v55  ;;  %1783 = vtanh.f32 %v1123_v44  ;;  %v1111_v60 = vmul.f32 %v1756_v42, %v954_v53  ;;  %v1127_v61 = vmul.f32 %v1760_v52, %v994_v54 }
 0x2bc   : > { %v1766_v62 = vpop.eup %1765  ;;  %1155 = vst [vmem:[%s2375_s20 + $0x48] sm:$0xff] %v1764_v59  ;;  %1785 = vtanh.f32 %v1113_v57 }
 0x2bd   : > { %v1768_v63 = vpop.eup %1767  ;;  %1146 = vst [vmem:[%s2375_s20] sm:$0xff] %v1766_v62  ;;  %1787 = vtanh.f32 %v1129_v58 }
 0x2be   : > { %v1770_v56 = vpop.eup %1769  ;;  %1154 = vst [vmem:[%s2375_s20 + $0x40] sm:$0xff] %v1768_v63  ;;  %1789 = vtanh.f32 %v1111_v60 }
 0x2bf   : > { %v1772_v0 = vpop.eup %1771  ;;  %1149 = vst [vmem:[%s2375_s20 + $0x18] sm:$0xff] %v1770_v56  ;;  %1791 = vtanh.f32 %v1127_v61 }
 0x2c0   : > { %v1774_v1 = vpop.eup %1773  ;;  %1157 = vst [vmem:[%s2375_s20 + $0x58] sm:$0xff] %v1772_v0 }
 0x2c1   : > { %v1776_v2 = vpop.eup %1775  ;;  %1148 = vst [vmem:[%s2375_s20 + $0x10] sm:$0xff] %v1774_v1 }
 0x2c2   : > { %v1778_v3 = vpop.eup %1777  ;;  %1156 = vst [vmem:[%s2375_s20 + $0x50] sm:$0xff] %v1776_v2 }
 0x2c3   : > { %v1780_v4 = vpop.eup %1779  ;;  %1151 = vst [vmem:[%s2375_s20 + $0x28] sm:$0xff] %v1778_v3 }
 0x2c4   : > { %v1782_v5 = vpop.eup %1781  ;;  %1159 = vst [vmem:[%s2375_s20 + $0x68] sm:$0xff] %v1780_v4 }
 0x2c5   : > { %v1784_v6 = vpop.eup %1783  ;;  %1150 = vst [vmem:[%s2375_s20 + $0x20] sm:$0xff] %v1782_v5 }
 0x2c6   : > { %v1786_v7 = vpop.eup %1785  ;;  %1158 = vst [vmem:[%s2375_s20 + $0x60] sm:$0xff] %v1784_v6 }
 0x2c7   : > { %v1788_v8 = vpop.eup %1787  ;;  %1153 = vst [vmem:[%s2375_s20 + $0x38] sm:$0xff] %v1786_v7 }
 0x2c8   : > { %v1790_v9 = vpop.eup %1789  ;;  %1161 = vst [vmem:[%s2375_s20 + $0x78] sm:$0xff] %v1788_v8 }
 0x2c9   : > { %v1792_v10 = vpop.eup %1791  ;;  %1152 = vst [vmem:[%s2375_s20 + $0x30] sm:$0xff] %v1790_v9 }
 0x2ca   : > { %1160 = vst [vmem:[%s2375_s20 + $0x70] sm:$0xff] %v1792_v10 }
 0x2cb PF: > { %s2616_s29 = sld [smem:[#allocation18_spill]]  ;;  %s2618_s15 = sld [smem:[#allocation25_spill]] }
 0x2cc   : > { %s2619_s12 = sld [smem:[#allocation30_spill]]  ;;  %s1176_s24 = sshll.u32 %s2375_s20, 4  ;;  %s2471_s24 = int_to_ptr.vmem [resolvable:$true] %s1176_s24 }
 0x2cd   : > { %s2475_s18 = scalar_lea.sflag [#allocation6], %s429_s11  ;;  %s1877_s6 = scalar_lea.vmem %s2471_s24, 2048 }
 0x2ce   : > { %p1878_p3 = scmp.ne.s32.totalorder %s2471_s24, %s1877_s6  ;;  %s2036_s16 = smov [#allocation10]  }
 0x2cf   : > { %s1881_s30 = sshll.u32 %s2036_s16, 4  ;;  %s1882_s30 = int_to_ptr.vmem [resolvable:$false] %s1881_s30 }
 0x2d0   : > { %s1883_s5 = scalar_lea.vmem %s1882_s30, 4096  ;;  %p1884_p11 = scmp.lt.s32.totalorder %s2471_s24, %s1882_s30 }
 0x2d1   : > { %s1374_s19 = sshll.u32 %s2616_s29, 11  ;;  %p2620_p12 = scmp.ne.s32.totalorder %s2618_s15, 0 }
 0x2d2   : > { %s2468_s17 = scalar_lea.hbm %s2619_s12, %s1374_s19  ;;  %p1885_p4 = scmp.lt.s32.totalorder %s1883_s5, %s1877_s6 }
 0x2d3   : > { %p1879_p9 = pnand %p1878_p3, %p2620_p12 }
 0x2d4   : > { %p1886_p13 = por %p1885_p4, %p1884_p11 }
 0x2d5   : > { %p1880_p7 = pneg %p1879_p9 }
 0x2d7   : > { %p1887_p8 = pnand %p1886_p13, %p1880_p7 }
 0x2d9   : > { %1890 = shalt.err (!%p1887_p8)
}
 0x2da   : > { %s1891_s11 = scalar_lea.hbm %s2468_s17, 2048  ;;  %s1895_s10 = scalar_lea.hbm %s2619_s12, 4096 }
 0x2db   : > { %p1892_p0 = scmp.ne.s32.totalorder %s2468_s17, %s1891_s11  ;;  %p1896_p2 = scmp.lt.u32.totalorder %s2468_s17, %s2619_s12 }
 0x2dc   : > { %p1897_p1 = scmp.lt.u32.totalorder %s1895_s10, %s1891_s11  ;;  %p1899_p3 = scmp.lt.u32.totalorder %s1891_s11, %s2468_s17 }
 0x2dd   : > { %p1893_p10 = pnand %p1892_p0, %p2620_p12 }
 0x2de   : > { %p1898_p5 = por %p1897_p1, %p1896_p2 }
 0x2df   : > { %p1894_p6 = pneg %p1893_p10 }
 0x2e0   : > { %p1900_p9 = por %p1899_p3, %p1898_p5 }
 0x2e2   : > { %p1901_p7 = pnand %p1900_p9, %p1894_p6 }
 0x2e4   : > { %1904 = shalt.err (!%p1901_p7)
}
 0x2e5   : > { %s2037_s14 = smov 128   ;;  %s2038_s29 = smov 8  }
 0x2e6   : > { %1583 = dma.vmem_to_hbm [thread:$0]  (%p2620_p12), %s2471_s24, 2048, %s2468_s17, %s2475_s18, %s2037_s14, %s2037_s14, %s2038_s29  }
 0x2e7 PF: > { %s2621_s0 = sld [smem:[#allocation15_spill]]  ;;  %s2622_s19 = sld [smem:[#allocation26_spill]] }
 0x2e8   : > { %p1595_p11 = scmp.ge.s32.totalorder %s2023_s9, 2 }
 0x2ed   : > { %s1191_s27 = sand.u32 1, %s2621_s0   ;;  %p2623_p4 = scmp.ne.s32.totalorder %s2622_s19, 0 }
 0x2ee   : > { %s1192_s21 = scalar_lea.sflag [#allocation6], %s1191_s27 }
 0x2ef   : > { %p1590_p13 = pnand %p1595_p11, %p2623_p4 }
 0x2f1   : > { %1970 = dma.done.wait (!%p1590_p13), %s1192_s21, 2048  }
 0x2f2   : > { %1972 = vsyncadd (!%p1590_p13), %s1192_s21, 4294965248  ;;  %s25_s9 = sadd.s32 1, %s2023_s9   ;;  %s2625_s21 = sld [smem:[#allocation16_spill]] }
 0x2f3   : > { %p2504_p8 = scmp.ge.s32.totalorder %s25_s9, 6   ;;  %s2626_s15 = sld [smem:[#allocation23_spill]] }
 0x2f4   : > { %s2627_s17 = sld [smem:[#allocation21_spill]]  ;;  %s2628_s18 = sld [smem:[#allocation22_spill]] }
 0x2f5   : > { %s2629_s16 = sld [smem:[#allocation19_spill]]  ;;  %s2630_s5 = sld [smem:[#allocation20_spill]] }
 0x2f6   : > { %s2631_s22 = smov %s1983_s23  ;;  %s2633_s24 = smov %s1991_s25 }
 0x2f7   : > { %s2634_s25 = smov %s1995_s26  ;;  %s2636_s27 = smov %s2003_s28 }
 0x2f8   : > { %s2638_s29 = smov %s2015_s7  ;;  %s2639_s30 = smov %s2019_s8 }
 0x2f9   : > { %s2632_s23 = smov %s2626_s15  ;;  %24 = sbr.rel (!%p2504_p8) target bundleno = 17 (0x11), region = 166 }
 0x2fa   : > { %s2635_s26 = smov %s2627_s17  ;;  %s2637_s28 = smov %s2628_s18 }
 0x2fb   : > { %s2640_s7 = smov %s2629_s16  ;;  %s2641_s8 = smov %s2630_s5 }
 0x300   :  { %1197 = vsyncpa [#allocation5], 1 }
 0x301   :  { %1199 = vsyncpa [#allocation5 + $0x1], 1 }
 0x302   :  { %1200 = vsyncpa [#allocation8], 1 }
 0x303   :  { %1202 = vsyncpa [#allocation8 + $0x1], 1 }
 0x304   :  { %1203 = vsyncpa [#allocation6], 1 }
 0x305   :  { %1205 = vsyncpa [#allocation6 + $0x1], 1 }

</bundles_post_ra>
